<compile_context>
chip_gen: v7x
topology: tpu7x:2x2x1
jax: 0.10.0
libtpu: 0.0.40
codegen_flags: <defaults>
</compile_context>

<pallas_src>
import jax
import jax.numpy as jnp
from jax import lax
from jax.experimental import pallas as pl
from jax.experimental.pallas import tpu as pltpu

NUM_EXPERTS = 8
TOP_K = 2


def _router_kernel(x_ref, w_ref, b_ref, noise_ref, probs_ref, idx_ref):
    # Single fused MXU matmul: [tm, D] @ [D, 2E] -> [tm, 2E] (f32 accumulate).
    fused = jnp.dot(x_ref[...], w_ref[...],
                    preferred_element_type=jnp.float32) + b_ref[...]
    tm = fused.shape[0]
    e = fused.shape[1] // 2
    logits = fused[:, :e]
    noise_logits = fused[:, e:]

    # Numerically-stable softplus(noise_logits) in f32.
    sp = jnp.maximum(noise_logits, 0.0) + jnp.log1p(jnp.exp(-jnp.abs(noise_logits)))

    # noisy_logits = logits + randn * softplus(noise_logits)
    noisy = logits + noise_ref[...].astype(jnp.float32) * sp

    e_iota = lax.broadcasted_iota(jnp.int32, (tm, e), 1)
    neg_inf = jnp.float32(-jnp.inf)

    # top-1
    v1 = jnp.max(noisy, axis=-1, keepdims=True)
    i1 = jnp.min(jnp.where(noisy == v1, e_iota, e), axis=-1, keepdims=True)
    # top-2: mask out the top-1 slot, take max again
    masked = jnp.where(e_iota == i1, neg_inf, noisy)
    v2 = jnp.max(masked, axis=-1, keepdims=True)
    i2 = jnp.min(jnp.where(masked == v2, e_iota, e), axis=-1, keepdims=True)

    # Scatter top-k values into a -inf tensor, then softmax over experts.
    topk_mask = (e_iota == i1) | (e_iota == i2)
    sparse = jnp.where(topk_mask, noisy, neg_inf)
    m = jnp.max(sparse, axis=-1, keepdims=True)
    ex = jnp.where(topk_mask, jnp.exp(sparse - m), 0.0)
    probs = ex * pl.reciprocal(jnp.sum(ex, axis=-1, keepdims=True))

    probs_ref[...] = probs.astype(probs_ref.dtype)

    # Single (tm, TOP_K) store for both indices (avoids two masked vst.msk).
    k_iota = lax.broadcasted_iota(jnp.int32, (tm, TOP_K), 1)
    idx_ref[...] = jnp.where(k_iota == 0, i1, i2).astype(jnp.int32)


def _auto_tm(d, e, x_itemsize, budget_bytes):
    """Pick the largest row tile that fits the VMEM budget (capped at 1024)."""
    # Double-buffered per-row streams: x, noise (f32), probs (f32), idx (i32).
    per_row = 2 * (d * x_itemsize + e * 4 + e * 4 + TOP_K * 4)
    # Resident constants (double-buffered by the pipeline): fused W + bias.
    fixed = 2 * (d * 2 * e + 2 * e) * 4
    tm = (budget_bytes - fixed) // max(per_row, 1)
    tm = int(max(8, min(1024, tm)))
    return (tm // 8) * 8


def router_forward(x, w_gate, b_gate, w_noise, b_noise, noise, *,
                   tm=None, vmem_budget_bytes=48 * 1024 * 1024):
    """x: (N, D); weights: (D, E); biases: (1, E); noise: (N, E) ~ N(0,1)."""
    n_tok, d = x.shape
    e = w_gate.shape[1]

    # Fuse the two projections into one (D, 2E) matmul outside the kernel.
    w_fused = jnp.concatenate([w_gate, w_noise], axis=1).astype(x.dtype)
    b_fused = jnp.concatenate([b_gate, b_noise], axis=1).astype(jnp.float32)

    # Tile sizing: large rows, but never bigger than the (8-aligned) token count.
    if tm is None:
        tm = _auto_tm(d, e, jnp.dtype(x.dtype).itemsize, vmem_budget_bytes)
    n_aligned = -(-n_tok // 8) * 8
    tm = max(8, min(tm, n_aligned))
    tm = (tm // 8) * 8

    # Pad rows to a multiple of tm (padded rows are sliced off the outputs).
    n_pad = -(-n_tok // tm) * tm
    if n_pad != n_tok:
        pad = n_pad - n_tok
        x_p = jnp.pad(x, ((0, pad), (0, 0)))
        noise_p = jnp.pad(noise, ((0, pad), (0, 0)))
    else:
        x_p, noise_p = x, noise

    grid = (n_pad // tm,)

    probs, idx = pl.pallas_call(
        _router_kernel,
        out_shape=(
            jax.ShapeDtypeStruct((n_pad, e), jnp.float32),
            jax.ShapeDtypeStruct((n_pad, TOP_K), jnp.int32),
        ),
        grid_spec=pltpu.PrefetchScalarGridSpec(
            num_scalar_prefetch=0,
            grid=grid,
            in_specs=[
                pl.BlockSpec((tm, d), lambda i: (i, 0)),        # x tile
                pl.BlockSpec((d, 2 * e), lambda i: (0, 0)),     # fused W (whole)
                pl.BlockSpec((1, 2 * e), lambda i: (0, 0)),     # fused bias
                pl.BlockSpec((tm, e), lambda i: (i, 0)),        # noise tile
            ],
            out_specs=[
                pl.BlockSpec((tm, e), lambda i: (i, 0)),
                pl.BlockSpec((tm, TOP_K), lambda i: (i, 0)),
            ],
        ),
        compiler_params=pltpu.CompilerParams(
            dimension_semantics=("parallel",),
            vmem_limit_bytes=64 * 1024 * 1024,
        ),
    )(x_p, w_fused, b_fused, noise_p)

    if n_pad != n_tok:
        probs = probs[:n_tok]
        idx = idx[:n_tok]
    return probs, idx


if __name__ == "__main__":
    batch, seq, n_embed = 2, 8, 32

    key = jax.random.PRNGKey(0)
    k_x, k_wg, k_bg, k_wn, k_bn, k_noise = jax.random.split(key, 6)

    # Deterministic parameter init (matches torch.nn.Linear fan-in uniform).
    bound = 1.0 / jnp.sqrt(n_embed)
    w_gate = jax.random.uniform(k_wg, (n_embed, NUM_EXPERTS), jnp.float32, -bound, bound)
    b_gate = jax.random.uniform(k_bg, (1, NUM_EXPERTS), jnp.float32, -bound, bound)
    w_noise = jax.random.uniform(k_wn, (n_embed, NUM_EXPERTS), jnp.float32, -bound, bound)
    b_noise = jax.random.uniform(k_bn, (1, NUM_EXPERTS), jnp.float32, -bound, bound)

    mh_output = jax.random.normal(k_x, (batch, seq, n_embed), jnp.float32)
    # torch.randn_like(logits) equivalent, generated outside the kernel.
    noise = jax.random.normal(k_noise, (batch, seq, NUM_EXPERTS), jnp.float32)

    x_flat = mh_output.reshape(batch * seq, n_embed)
    noise_flat = noise.reshape(batch * seq, NUM_EXPERTS)

    probs_flat, idx_flat = router_forward(
        x_flat, w_gate, b_gate, w_noise, b_noise, noise_flat)
    router_output = probs_flat.reshape(batch, seq, NUM_EXPERTS)
    indices = idx_flat.reshape(batch, seq, TOP_K)

    jax.block_until_ready((router_output, indices))

    # Sanity check against a pure-JAX reference with the same noise.
    logits = x_flat @ w_gate + b_gate
    nlogits = x_flat @ w_noise + b_noise
    noisy = logits + noise_flat * jax.nn.softplus(nlogits)
    topv, topi = lax.top_k(noisy, TOP_K)
    mask = jnp.any(jnp.arange(NUM_EXPERTS)[None, None, :] == topi[:, :, None], axis=1)
    ref_probs = jax.nn.softmax(jnp.where(mask, noisy, -jnp.inf), axis=-1)
    assert jnp.allclose(probs_flat, ref_probs, atol=1e-5)
    assert jnp.all(jnp.sort(idx_flat, axis=-1) == jnp.sort(topi.astype(jnp.int32), axis=-1))

    print("KERNEL_OK")
</pallas_src>

<mosaic_0001>
module attributes {stable_mosaic.version = 11 : i64} {
  func.func @_router_kernel(%arg0: i32, %arg1: memref<16x32xf32, #tpu.memory_space<vmem>>, %arg2: memref<32x16xf32, #tpu.memory_space<vmem>>, %arg3: memref<1x16xf32, #tpu.memory_space<vmem>>, %arg4: memref<16x8xf32, #tpu.memory_space<vmem>>, %arg5: memref<16x8xf32, #tpu.memory_space<vmem>>, %arg6: memref<16x2xi32, #tpu.memory_space<vmem>>) attributes {dimension_semantics = [#tpu.dimension_semantics<parallel>], iteration_bounds = array<i64: 1>, scalar_prefetch = 0 : i64, scratch_operands = 0 : i64, tpu.core_type = #tpu.core_type<tc>, window_params = [{transform_indices = @transform_0, window_bounds = array<i64: 16, 32>}, {pipeline_mode = #tpu.pipeline_mode<synchronous>, transform_indices = @transform_1, window_bounds = array<i64: 32, 16>}, {pipeline_mode = #tpu.pipeline_mode<synchronous>, transform_indices = @transform_2, window_bounds = array<i64: 1, 16>}, {transform_indices = @transform_3, window_bounds = array<i64: 16, 8>}, {transform_indices = @transform_4, window_bounds = array<i64: 16, 8>}, {transform_indices = @transform_5, window_bounds = array<i64: 16, 2>}]} {
    %c0 = arith.constant 0 : index
    %c0_0 = arith.constant 0 : index
    %0 = vector.load %arg1[%c0, %c0_0] : memref<16x32xf32, #tpu.memory_space<vmem>>, vector<16x32xf32>
    %c0_1 = arith.constant 0 : index
    %c0_2 = arith.constant 0 : index
    %1 = vector.load %arg2[%c0_1, %c0_2] : memref<32x16xf32, #tpu.memory_space<vmem>>, vector<32x16xf32>
    %cst = arith.constant dense<0.000000e+00> : vector<16x16xf32>
    %2 = tpu.matmul %0, %1, %cst {dimension_numbers = #tpu.dot_dimension_numbers<[1], [0], [0], [1], [0, 0, 1, 1], [], []>} : vector<16x32xf32>, vector<32x16xf32>, vector<16x16xf32> -> vector<16x16xf32>
    %c0_3 = arith.constant 0 : index
    %c0_4 = arith.constant 0 : index
    %3 = vector.load %arg3[%c0_3, %c0_4] : memref<1x16xf32, #tpu.memory_space<vmem>>, vector<1x16xf32>
    %4 = vector.broadcast %3 : vector<1x16xf32> to vector<16x16xf32>
    %5 = arith.addf %2, %4 : vector<16x16xf32>
    %6 = vector.extract_strided_slice %5 {offsets = [0, 0], sizes = [16, 8], strides = [1, 1]} : vector<16x16xf32> to vector<16x8xf32>
    %7 = vector.extract_strided_slice %5 {offsets = [0, 8], sizes = [16, 8], strides = [1, 1]} : vector<16x16xf32> to vector<16x8xf32>
    %cst_5 = arith.constant 0.000000e+00 : f32
    %8 = vector.broadcast %cst_5 : f32 to vector<16x8xf32>
    %9 = arith.maximumf %7, %8 : vector<16x8xf32>
    %10 = math.absf %7 : vector<16x8xf32>
    %cst_6 = arith.constant 0.000000e+00 : f32
    %11 = vector.broadcast %cst_6 : f32 to vector<16x8xf32>
    %12 = arith.subf %11, %10 : vector<16x8xf32>
    %13 = math.exp %12 : vector<16x8xf32>
    %14 = math.log1p %13 : vector<16x8xf32>
    %15 = arith.addf %9, %14 : vector<16x8xf32>
    %c0_7 = arith.constant 0 : index
    %c0_8 = arith.constant 0 : index
    %16 = vector.load %arg4[%c0_7, %c0_8] : memref<16x8xf32, #tpu.memory_space<vmem>>, vector<16x8xf32>
    %17 = arith.mulf %16, %15 : vector<16x8xf32>
    %18 = arith.addf %6, %17 : vector<16x8xf32>
    %19 = tpu.iota {dimensions = array<i32: 1>} : vector<16x8xi32>
    %cst_9 = arith.constant dense<0xFF800000> : vector<16xf32>
    %20 = vector.multi_reduction <maximumf>, %18, %cst_9 [1] : vector<16x8xf32> to vector<16xf32>
    %21 = vector.shape_cast %20 : vector<16xf32> to vector<16x1xf32>
    %22 = vector.broadcast %21 : vector<16x1xf32> to vector<16x8xf32>
    %23 = arith.cmpf oeq, %18, %22 : vector<16x8xf32>
    %c8_i32 = arith.constant 8 : i32
    %24 = vector.broadcast %c8_i32 : i32 to vector<16x8xi32>
    %25 = arith.select %23, %19, %24 : vector<16x8xi1>, vector<16x8xi32>
    %cst_10 = arith.constant dense<2147483647> : vector<16xi32>
    %26 = vector.multi_reduction <minsi>, %25, %cst_10 [1] : vector<16x8xi32> to vector<16xi32>
    %27 = vector.shape_cast %26 : vector<16xi32> to vector<16x1xi32>
    %28 = vector.broadcast %27 : vector<16x1xi32> to vector<16x8xi32>
    %29 = arith.cmpi eq, %19, %28 : vector<16x8xi32>
    %cst_11 = arith.constant 0xFF800000 : f32
    %30 = vector.broadcast %cst_11 : f32 to vector<16x8xf32>
    %31 = arith.select %29, %30, %18 : vector<16x8xi1>, vector<16x8xf32>
    %cst_12 = arith.constant dense<0xFF800000> : vector<16xf32>
    %32 = vector.multi_reduction <maximumf>, %31, %cst_12 [1] : vector<16x8xf32> to vector<16xf32>
    %33 = vector.shape_cast %32 : vector<16xf32> to vector<16x1xf32>
    %34 = vector.broadcast %33 : vector<16x1xf32> to vector<16x8xf32>
    %35 = arith.cmpf oeq, %31, %34 : vector<16x8xf32>
    %c8_i32_13 = arith.constant 8 : i32
    %36 = vector.broadcast %c8_i32_13 : i32 to vector<16x8xi32>
    %37 = arith.select %35, %19, %36 : vector<16x8xi1>, vector<16x8xi32>
    %cst_14 = arith.constant dense<2147483647> : vector<16xi32>
    %38 = vector.multi_reduction <minsi>, %37, %cst_14 [1] : vector<16x8xi32> to vector<16xi32>
    %39 = vector.shape_cast %38 : vector<16xi32> to vector<16x1xi32>
    %40 = vector.broadcast %27 : vector<16x1xi32> to vector<16x8xi32>
    %41 = arith.cmpi eq, %19, %40 : vector<16x8xi32>
    %42 = vector.broadcast %39 : vector<16x1xi32> to vector<16x8xi32>
    %43 = arith.cmpi eq, %19, %42 : vector<16x8xi32>
    %44 = arith.ori %41, %43 : vector<16x8xi1>
    %cst_15 = arith.constant 0xFF800000 : f32
    %45 = vector.broadcast %cst_15 : f32 to vector<16x8xf32>
    %46 = arith.select %44, %18, %45 : vector<16x8xi1>, vector<16x8xf32>
    %cst_16 = arith.constant dense<0xFF800000> : vector<16xf32>
    %47 = vector.multi_reduction <maximumf>, %46, %cst_16 [1] : vector<16x8xf32> to vector<16xf32>
    %48 = vector.shape_cast %47 : vector<16xf32> to vector<16x1xf32>
    %49 = vector.broadcast %48 : vector<16x1xf32> to vector<16x8xf32>
    %50 = arith.subf %46, %49 : vector<16x8xf32>
    %51 = math.exp %50 : vector<16x8xf32>
    %cst_17 = arith.constant 0.000000e+00 : f32
    %52 = vector.broadcast %cst_17 : f32 to vector<16x8xf32>
    %53 = arith.select %44, %51, %52 : vector<16x8xi1>, vector<16x8xf32>
    %cst_18 = arith.constant dense<0.000000e+00> : vector<16xf32>
    %54 = vector.multi_reduction <add>, %53, %cst_18 [1] : vector<16x8xf32> to vector<16xf32>
    %55 = vector.shape_cast %54 : vector<16xf32> to vector<16x1xf32>
    %56 = tpu.reciprocal %55 : vector<16x1xf32> -> vector<16x1xf32>
    %57 = vector.broadcast %56 : vector<16x1xf32> to vector<16x8xf32>
    %58 = arith.mulf %53, %57 : vector<16x8xf32>
    %c0_19 = arith.constant 0 : index
    %c0_20 = arith.constant 0 : index
    %59 = vector.load %arg5[%c0_19, %c0_20] : memref<16x8xf32, #tpu.memory_space<vmem>>, vector<16x8xf32>
    tpu.vector_store %arg5[%c0_19, %c0_20], %58 {strides = array<i32>} : memref<16x8xf32, #tpu.memory_space<vmem>>, vector<16x8xf32>,
    %60 = tpu.iota {dimensions = array<i32: 1>} : vector<16x2xi32>
    %c0_i32 = arith.constant 0 : i32
    %61 = vector.broadcast %c0_i32 : i32 to vector<16x2xi32>
    %62 = arith.cmpi eq, %60, %61 : vector<16x2xi32>
    %63 = vector.shape_cast %27 : vector<16x1xi32> to vector<16x1xi32>
    %64 = vector.broadcast %63 : vector<16x1xi32> to vector<16x2xi32>
    %65 = vector.shape_cast %39 : vector<16x1xi32> to vector<16x1xi32>
    %66 = vector.broadcast %65 : vector<16x1xi32> to vector<16x2xi32>
    %67 = arith.select %62, %64, %66 : vector<16x2xi1>, vector<16x2xi32>
    %c0_21 = arith.constant 0 : index
    %c0_22 = arith.constant 0 : index
    %68 = vector.load %arg6[%c0_21, %c0_22] : memref<16x2xi32, #tpu.memory_space<vmem>>, vector<16x2xi32>
    tpu.vector_store %arg6[%c0_21, %c0_22], %67 {strides = array<i32>} : memref<16x2xi32, #tpu.memory_space<vmem>>, vector<16x2xi32>,
    return
  }
  func.func @transform_0(%arg0: i32) -> (i32, i32) {
    %c0_i32 = arith.constant 0 : i32
    %c0_i32_0 = arith.constant 0 : i32
    return %arg0, %c0_i32 : i32, i32
  }
  func.func @transform_1(%arg0: i32) -> (i32, i32) {
    %c0_i32 = arith.constant 0 : i32
    %c0_i32_0 = arith.constant 0 : i32
    %c0_i32_1 = arith.constant 0 : i32
    return %c0_i32, %c0_i32_0 : i32, i32
  }
  func.func @transform_2(%arg0: i32) -> (i32, i32) {
    %c0_i32 = arith.constant 0 : i32
    %c0_i32_0 = arith.constant 0 : i32
    %c0_i32_1 = arith.constant 0 : i32
    return %c0_i32, %c0_i32_0 : i32, i32
  }
  func.func @transform_3(%arg0: i32) -> (i32, i32) {
    %c0_i32 = arith.constant 0 : i32
    %c0_i32_0 = arith.constant 0 : i32
    return %arg0, %c0_i32 : i32, i32
  }
  func.func @transform_4(%arg0: i32) -> (i32, i32) {
    %c0_i32 = arith.constant 0 : i32
    %c0_i32_0 = arith.constant 0 : i32
    return %arg0, %c0_i32 : i32, i32
  }
  func.func @transform_5(%arg0: i32) -> (i32, i32) {
    %c0_i32 = arith.constant 0 : i32
    %c0_i32_0 = arith.constant 0 : i32
    return %arg0, %c0_i32 : i32, i32
  }
}

</mosaic_0001>

<bundles_post_ra>
// kernel: tpu_custom_call.1
= control target key start
LH: loop header
LB: loop body
LE: loop exit
PB: predicated region body
PF: predicated region fallthrough
CT: control target
= control target key end

     0   :  { %11 = vsyncpa [#allocation3], 0  ;;  %s771_s0 = inlined_call_operand.hbm [shape: f32[16,32], index: 0, kind: input, shape index: {}]   ;;  %s772_s1 = inlined_call_operand.hbm [shape: f32[32,16], index: 1, kind: input, shape index: {}]   ;;  %s773_s2 = inlined_call_operand.hbm [shape: f32[1,16], index: 2, kind: input, shape index: {}]   ;;  %s774_s3 = inlined_call_operand.hbm [shape: f32[16,8], index: 3, kind: input, shape index: {}]   ;;  %s775_s4 = inlined_call_operand.hbm [shape: f32[16,8], index: 4, kind: output, shape index: {0}]   ;;  %s776_s5 = inlined_call_operand.hbm [shape: s32[16,2], index: 5, kind: output, shape index: {1}]  }
   0x1   :  { %12 = vsyncpa [#allocation6], 0 }
   0x2   :  { %13 = vsyncpa [#allocation9], 0 }
   0x3   :  { %14 = vsyncpa [#allocation4], 0 }
   0x4   :  { %15 = vsyncpa [#allocation12], 0  ;;  %s568_s18 = smov [#allocation5]   ;;  %s569_s20 = smov [#allocation2]  }
   0x5   :  { %s33_s19 = sshll.u32 %s568_s18, 4  ;;  %s21_s21 = sshll.u32 %s569_s20, 4  ;;  %s34_s19 = int_to_ptr.vmem [resolvable:$true] %s33_s19  ;;  %s607_s21 = int_to_ptr.vmem [resolvable:$true] %s21_s21 }
   0x6   :  { %s426_s24 = scalar_lea.hbm %s772_s1, 512 }
   0x7   :  { %p427_p0 = scmp.ne.s32.totalorder %s772_s1, %s426_s24  ;;  %p430_p1 = scmp.lt.u32.totalorder %s426_s24, %s772_s1 }
   0x9   :  { %p432_p2 = pnand %p430_p1, %p427_p0 }
   0xb   :  { %435 = shalt.err (!%p432_p2)
}
   0xc   :  { %s436_s29 = scalar_lea.vmem %s34_s19, 512  ;;  %p441_p4 = scmp.lt.s32.totalorder %s34_s19, %s34_s19 }
   0xd   :  { %p437_p3 = scmp.ne.s32.totalorder %s34_s19, %s436_s29  ;;  %p442_p5 = scmp.lt.s32.totalorder %s436_s29, %s436_s29 }
   0xf   :  { %p443_p6 = por %p442_p5, %p441_p4 }
  0x11   :  { %p444_p7 = pnand %p443_p6, %p437_p3 }
  0x13   :  { %447 = shalt.err (!%p444_p7)
}
  0x14   :  { %s570_s30 = smov 128   ;;  %s571_s6 = smov 8  }
  0x15   :  { %39 = dma.hbm_to_vmem [thread:$0]  %s772_s1, 512, %s34_s19, [#allocation6], %s570_s30, %s570_s30, %s571_s6  }
  0x16   :  { %s448_s11 = scalar_lea.hbm %s771_s0, 256 }
  0x17   :  { %p449_p8 = scmp.ne.s32.totalorder %s771_s0, %s448_s11  ;;  %p452_p9 = scmp.lt.u32.totalorder %s448_s11, %s771_s0 }
  0x19   :  { %p454_p10 = pnand %p452_p9, %p449_p8 }
  0x1b   :  { %457 = shalt.err (!%p454_p10)
}
  0x1c   :  { %s458_s16 = scalar_lea.vmem %s607_s21, 256  ;;  %p463_p12 = scmp.lt.s32.totalorder %s607_s21, %s607_s21 }
  0x1d   :  { %p459_p11 = scmp.ne.s32.totalorder %s607_s21, %s458_s16  ;;  %p464_p13 = scmp.lt.s32.totalorder %s458_s16, %s458_s16 }
  0x1f   :  { %p465_p0 = por %p464_p13, %p463_p12 }
  0x21   :  { %p466_p1 = pnand %p465_p0, %p459_p11 }
  0x23   :  { %469 = shalt.err (!%p466_p1)
}
  0x24   :  { %27 = dma.hbm_to_vmem [thread:$0]  %s771_s0, 256, %s607_s21, [#allocation3], %s570_s30, %s570_s30, %s571_s6  }
  0x25   :  { %s572_s18 = smov [#allocation7]   ;;  %s573_s20 = smov [#allocation8]  }
  0x26   :  { %s46_s19 = sshll.u32 %s572_s18, 4  ;;  %s55_s22 = sshll.u32 %s573_s20, 4  ;;  %s47_s19 = int_to_ptr.vmem [resolvable:$true] %s46_s19  ;;  %s644_s22 = int_to_ptr.vmem [resolvable:$true] %s55_s22 }
  0x27   :  { %s470_s25 = scalar_lea.hbm %s773_s2, 16 }
  0x28   :  { %p471_p2 = scmp.ne.s32.totalorder %s773_s2, %s470_s25  ;;  %p474_p3 = scmp.lt.u32.totalorder %s470_s25, %s773_s2 }
  0x2a   :  { %p476_p4 = pnand %p474_p3, %p471_p2 }
  0x2c   :  { %479 = shalt.err (!%p476_p4)
}
  0x2d   :  { %s480_s0 = scalar_lea.vmem %s47_s19, 16  ;;  %s484_s21 = scalar_lea.vmem %s47_s19, 32 }
  0x2e   :  { %p481_p5 = scmp.ne.s32.totalorder %s47_s19, %s480_s0  ;;  %p485_p6 = scmp.lt.s32.totalorder %s47_s19, %s47_s19 }
  0x2f   :  { %p486_p7 = scmp.lt.s32.totalorder %s484_s21, %s480_s0 }
  0x31   :  { %p487_p8 = por %p486_p7, %p485_p6 }
  0x33   :  { %p488_p9 = pnand %p487_p8, %p481_p5 }
  0x35   :  { %491 = shalt.err (!%p488_p9)
}
  0x36   :  { %49 = dma.hbm_to_vmem [thread:$0]  %s773_s2, 16, %s47_s19, [#allocation6]  }
  0x37   :  { %s492_s11 = scalar_lea.hbm %s774_s3, 256 }
  0x38   :  { %p493_p10 = scmp.ne.s32.totalorder %s774_s3, %s492_s11  ;;  %p496_p11 = scmp.lt.u32.totalorder %s492_s11, %s774_s3 }
  0x3a   :  { %p498_p12 = pnand %p496_p11, %p493_p10 }
  0x3c   :  { %501 = shalt.err (!%p498_p12)
}
  0x3d   :  { %s502_s16 = scalar_lea.vmem %s644_s22, 256  ;;  %p507_p0 = scmp.lt.s32.totalorder %s644_s22, %s644_s22 }
  0x3e   :  { %p503_p13 = scmp.ne.s32.totalorder %s644_s22, %s502_s16  ;;  %p508_p1 = scmp.lt.s32.totalorder %s502_s16, %s502_s16 }
  0x40   :  { %p509_p2 = por %p508_p1, %p507_p0 }
  0x42   :  { %p510_p3 = pnand %p509_p2, %p503_p13 }
  0x44   :  { %513 = shalt.err (!%p510_p3)
}
  0x45   :  { %61 = dma.hbm_to_vmem [thread:$0]  %s774_s3, 256, %s644_s22, [#allocation9], %s570_s30, %s570_s30, %s571_s6  }
  0x46   :  { %558 = dma.done.wait [#allocation3], 256  }
  0x47   :  { %559 = vsyncadd [#allocation3], 4294967040 }
  0x48   :  { %560 = dma.done.wait [#allocation6], 528  }
  0x49   :  { %561 = vsyncadd [#allocation6], 4294966768 }
  0x4a   :  { %562 = dma.done.wait [#allocation9], 256  }
  0x4b   :  { %563 = vsyncadd [#allocation9], 4294967040  ;;  %vm87_vm0 = vcmask 261120   ;;  %v76_v0 = vld [vmem:[#allocation5] sm:$0xff]  ;;  %v77_v1 = vld [vmem:[#allocation5 + $0x8] sm:$0xff]  ;;  %s574_s3 = smov 120   ;;  %v213_v51 = vlaneseq }
  0x4c   :  { %v78_v2 = vld [vmem:[#allocation5 + $0x10] sm:$0xff]  ;;  %v393_v3 = vpack.c.bf16 %v77_v1, %v76_v0  ;;  %v79_v4 = vld [vmem:[#allocation5 + $0x18] sm:$0xff]  ;;  %v373_v8 = vld [vmem:[#allocation7] ss:$0 sm:$0xff]  ;;  %vm215_vm3 = vcmask 64512   ;;  %vm335_vm15 = vcmask 15360  }
  0x4d   :  { %v74_v5 = vld [vmem:[#allocation2] sm:$0xff]  ;;  %v397_v6 = vpack.c.bf16 %v79_v4, %v78_v2  ;;  %v75_v7 = vld [vmem:[#allocation2 + $0x8] sm:$0xff]  ;;  %v199_v41 = vld [vmem:[#allocation8] sm:$0xff]  ;;  %v686_v52 = vand.u32 127, %v213_v51  ;;  %s575_s17 = smov [#allocation11]  }
  0x4e   :  { %390 = vmatprep.mubr.msk.f32.mxu0 %vm87_vm0, %v74_v5  ;;  %394 = vmatprep.subr.bf16.mxu0 %v393_v3  ;;  %v200_v44 = vld [vmem:[#allocation8 + $0x8] sm:$0xff]  ;;  %s355_s18 = sshll.u32 %s575_s17, 4  ;;  %s356_s18 = int_to_ptr.vmem [resolvable:$true] %s355_s18 }
  0x4f   :  { %396 = vmatpush3.bf16.msra.mxu0 %v393_v3  ;;  %vm332_vm14 = vcmp.eq.s32.totalorder %v686_v52, 0  ;;  %s514_s19 = scalar_lea.vmem %s356_s18, 256  ;;  %p519_p5 = scmp.lt.s32.totalorder %s356_s18, %s356_s18 }
  0x50   :  { %398 = vmatprep.subr.bf16.mxu0 %v397_v6  ;;  %p515_p4 = scmp.ne.s32.totalorder %s356_s18, %s514_s19  ;;  %p520_p6 = scmp.lt.s32.totalorder %s514_s19, %s514_s19 }
  0x52   :  { %p521_p7 = por %p520_p6, %p519_p5 }
  0x53   :  { %400 = vmatpush3.bf16.msra.mxu0 %v397_v6 }
  0x54   :  { %p522_p8 = pnand %p521_p7, %p515_p4 }
  0x56   :  { %391 = vmatmul.mubr.msk.f32.vlgmr.msra.gmra.mrb[0].mxu0 %vm87_vm0, %v75_v7 }
 0x129   :  { %v392_v9 = vpop.f32.mrb[0].mxu0 }
 0x12a   :  { %v166_v10 = vadd.f32 %v392_v9, %v373_v8  ;;  %v160_v11 = vpop.f32.mrb[1].mxu0 }
 0x12b   :  { %v161_v12 = vadd.f32 %v373_v8, %v160_v11 }
 0x12c   :  { %v172_v13 = vand.u32 2147483647, %v166_v10  ;;  %v170_v39 = vmax.f32 %v166_v10, 0.0 }
 0x12d   :  { %v171_v14 = vand.u32 2147483647, %v161_v12  ;;  %v169_v34 = vmax.f32 %v161_v12, 0.0 }
 0x12e   :  { %v174_v15 = vsub.f32 0.0, %v172_v13 }
 0x12f   :  { %v173_v16 = vsub.f32 0.0, %v171_v14 }
 0x130   :  { %v177_v17 = vmul.f32 1.442695, %v174_v15 }
 0x131   :  { %v175_v18 = vmul.f32 1.442695, %v173_v16 }
 0x132   :  { %410 = vpow2.f32 %v177_v17 }
 0x133   :  { %412 = vpow2.f32 %v175_v18 }
 0x13c   :  { %v411_v19 = vpop.eup %410 }
 0x13d   :  { %v413_v20 = vpop.eup %412  ;;  %v188_v21 = vadd.f32 1.0, %v411_v19  ;;  %v191_v24 = vmul.f32 -0.5, %v411_v19  ;;  %v194_v30 = vand.u32 2147483647, %v411_v19 }
 0x13e   :  { %v179_v22 = vadd.f32 1.0, %v413_v20  ;;  %v182_v23 = vmul.f32 -0.5, %v413_v20  ;;  %v185_v26 = vand.u32 2147483647, %v413_v20 }
 0x13f   :  { %414 = vlog2.f32 %v188_v21  ;;  %v192_v28 = vadd.f32 1.0, %v191_v24  ;;  %vm195_vm2 = vcmp.lt.f32.partialorder %v194_v30, 0.0004427343 }
 0x140   :  { %416 = vlog2.f32 %v179_v22  ;;  %v183_v25 = vadd.f32 1.0, %v182_v23  ;;  %vm186_vm1 = vcmp.lt.f32.partialorder %v185_v26, 0.0004427343 }
 0x141   :  { %v193_v36 = vmul.f32 %v411_v19, %v192_v28 }
 0x142   :  { %v184_v32 = vmul.f32 %v413_v20, %v183_v25 }
 0x149   :  { %v415_v27 = vpop.eup %414 }
 0x14a   :  { %v417_v29 = vpop.eup %416  ;;  %v190_v33 = vmul.f32 0.6931472, %v415_v27 }
 0x14b   :  { %v181_v31 = vmul.f32 0.6931472, %v417_v29 }
 0x14c   :  { %v196_v38 = vsel %vm195_vm2, %v193_v36, %v190_v33 }
 0x14d   :  { %v187_v35 = vsel %vm186_vm1, %v184_v32, %v181_v31  ;;  %v198_v40 = vadd.f32 %v196_v38, %v170_v39 }
 0x14e   :  { %v197_v37 = vadd.f32 %v187_v35, %v169_v34 }
 0x150   :  { %203 = vrot.lane.b32.xlu0 %v197_v37, %s574_s3 }
 0x154   :  { %205 = vrot.lane.b32.xlu0 %v198_v40, %s574_s3 }
 0x1c2   :  { %v204_v42 = vpop.permute.xlu0 %203 }
 0x1c3   :  { %v209_v43 = vmul.f32 %v204_v42, %v199_v41 }
 0x1c5   :  { %v678_v45 = vadd.f32 %v209_v43, %v161_v12 }
 0x1c6   :  { %v206_v46 = vpop.permute.xlu0 %205 }
 0x1c7   :  { %v210_v47 = vmul.f32 %v206_v46, %v200_v44  ;;  %v216_v48 = vsel %vm215_vm3, %v678_v45, -inf }
 0x1c8   :  { %217 = vmax.xlane.f32.xlu1 %v216_v48 }
 0x1c9   :  { %v682_v49 = vadd.f32 %v210_v47, %v166_v10 }
 0x1cb   :  { %v219_v50 = vsel %vm215_vm3, %v682_v49, -inf }
 0x1cc   :  { %220 = vmax.xlane.f32.xlu1 %v219_v50 }
 0x255   :  { %v218_v53 = vpop.xlane.xlu1 %217 }
 0x256   :  { %vm222_vm4 = vcmp.eq.f32.partialorder %v678_v45, %v218_v53 }
 0x257   :  { %v224_v54 = vsel %vm222_vm4, %v686_v52, 8 }
 0x258   :  { %v226_v55 = vsel %vm215_vm3, %v224_v54, 2147483647 }
 0x259   :  { %v221_v56 = vpop.xlane.xlu1 %220  ;;  %v228_v57 = vshra.s32 %v226_v55, 16  ;;  %v227_v63 = vand.u32 65535, %v226_v55 }
 0x25a   :  { %vm223_vm5 = vcmp.eq.f32.partialorder %v682_v49, %v221_v56 }
 0x25b   :  { %v225_v58 = vsel %vm223_vm5, %v686_v52, 8  ;;  %v230_v59 = vcvt.s32.f32 %v228_v57  ;;  %v229_v1 = vcvt.s32.f32 %v227_v63 }
 0x25c   :  { %v241_v60 = vsel %vm215_vm3, %v225_v58, 2147483647 }
 0x25d   :  { %231 = vmin.xlane.f32.xlu0 %v230_v59  ;;  %v243_v61 = vshra.s32 %v241_v60, 16  ;;  %v242_v2 = vand.u32 65535, %v241_v60 }
 0x25f   :  { %v245_v62 = vcvt.s32.f32 %v243_v61  ;;  %v244_v5 = vcvt.s32.f32 %v242_v2 }
 0x261   :  { %246 = vmin.xlane.f32.xlu1 %v245_v62 }
 0x2ea   :  { %v232_v0 = vpop.xlane.xlu0 %231 }
 0x2eb   :  { %vm233_vm6 = vcmp.eq.f32.partialorder %v230_v59, %v232_v0  ;;  %v238_v7 = vcvt.f32.s32 %v232_v0 }
 0x2ec   :  { %v234_v3 = vsel %vm233_vm6, %v229_v1, inf }
 0x2ed   :  { %235 = vmin.xlane.f32.xlu1 %v234_v3  ;;  %v239_v9 = vshll.u32 %v238_v7, 16 }
 0x2ee   :  { %v247_v4 = vpop.xlane.xlu1 %246 }
 0x2ef   :  { %vm248_vm7 = vcmp.eq.f32.partialorder %v245_v62, %v247_v4  ;;  %v253_v10 = vcvt.f32.s32 %v247_v4 }
 0x2f0   :  { %v249_v6 = vsel %vm248_vm7, %v244_v5, inf }
 0x2f1   :  { %250 = vmin.xlane.f32.xlu1 %v249_v6  ;;  %v254_v14 = vshll.u32 %v253_v10, 16 }
 0x37a   :  { %v236_v8 = vpop.xlane.xlu1 %235 }
 0x37b   :  { %v237_v11 = vcvt.f32.s32 %v236_v8 }
 0x37d   :  { %v240_v12 = vadd.s32 %v239_v9, %v237_v11 }
 0x37e   :  { %v251_v13 = vpop.xlane.xlu1 %250 }
 0x37f   :  { %v252_v15 = vcvt.f32.s32 %v251_v13  ;;  %vm256_vm8 = vcmp.eq.s32.totalorder %v686_v52, %v240_v12 }
 0x380   :  { %v258_v16 = vsel %vm256_vm8, -inf, %v678_v45 }
 0x381   :  { %v255_v17 = vadd.s32 %v254_v14, %v252_v15  ;;  %v260_v18 = vsel %vm215_vm3, %v258_v16, -inf }
 0x382   :  { %261 = vmax.xlane.f32.xlu1 %v260_v18 }
 0x383   :  { %vm257_vm9 = vcmp.eq.s32.totalorder %v686_v52, %v255_v17 }
 0x384   :  { %v259_v19 = vsel %vm257_vm9, -inf, %v682_v49 }
 0x385   :  { %v263_v20 = vsel %vm215_vm3, %v259_v19, -inf }
 0x386   :  { %264 = vmax.xlane.f32.xlu1 %v263_v20 }
 0x40f   :  { %v262_v21 = vpop.xlane.xlu1 %261 }
 0x410   :  { %vm266_vm10 = vcmp.eq.f32.partialorder %v258_v16, %v262_v21 }
 0x411   :  { %v268_v22 = vsel %vm266_vm10, %v686_v52, 8 }
 0x412   :  { %v270_v23 = vsel %vm215_vm3, %v268_v22, 2147483647 }
 0x413   :  { %v265_v24 = vpop.xlane.xlu1 %264  ;;  %v272_v25 = vshra.s32 %v270_v23, 16  ;;  %v271_v31 = vand.u32 65535, %v270_v23 }
 0x414   :  { %vm267_vm11 = vcmp.eq.f32.partialorder %v259_v19, %v265_v24 }
 0x415   :  { %v269_v26 = vsel %vm267_vm11, %v686_v52, 8  ;;  %v274_v27 = vcvt.s32.f32 %v272_v25  ;;  %v273_v33 = vcvt.s32.f32 %v271_v31 }
 0x416   :  { %v285_v28 = vsel %vm215_vm3, %v269_v26, 2147483647 }
 0x417   :  { %275 = vmin.xlane.f32.xlu1 %v274_v27  ;;  %v287_v29 = vshra.s32 %v285_v28, 16  ;;  %v286_v34 = vand.u32 65535, %v285_v28 }
 0x419   :  { %v289_v30 = vcvt.s32.f32 %v287_v29  ;;  %v288_v37 = vcvt.s32.f32 %v286_v34 }
 0x41b   :  { %290 = vmin.xlane.f32.xlu1 %v289_v30 }
 0x4a4   :  { %v276_v32 = vpop.xlane.xlu1 %275 }
 0x4a5   :  { %vm277_vm12 = vcmp.eq.f32.partialorder %v274_v27, %v276_v32  ;;  %v282_v39 = vcvt.f32.s32 %v276_v32 }
 0x4a6   :  { %v278_v35 = vsel %vm277_vm12, %v273_v33, inf }
 0x4a7   :  { %279 = vmin.xlane.f32.xlu1 %v278_v35  ;;  %v283_v41 = vshll.u32 %v282_v39, 16 }
 0x4a8   :  { %v291_v36 = vpop.xlane.xlu1 %290 }
 0x4a9   :  { %vm292_vm13 = vcmp.eq.f32.partialorder %v289_v30, %v291_v36  ;;  %v297_v42 = vcvt.f32.s32 %v291_v36 }
 0x4aa   :  { %v293_v38 = vsel %vm292_vm13, %v288_v37, inf }
 0x4ab   :  { %294 = vmin.xlane.f32.xlu0 %v293_v38  ;;  %v298_v47 = vshll.u32 %v297_v42, 16 }
 0x534   :  { %v280_v40 = vpop.xlane.xlu1 %279 }
 0x535   :  { %v281_v43 = vcvt.f32.s32 %v280_v40 }
 0x537   :  { %v284_v44 = vadd.s32 %v283_v41, %v281_v43 }
 0x538   :  { %v295_v46 = vpop.xlane.xlu0 %294 }
 0x539   :  { %v296_v48 = vcvt.f32.s32 %v295_v46  ;;  %vm300_vm0 = vcmp.eq.s32.totalorder %v686_v52, %v284_v44  ;;  %v333_v50 = vsel %vm332_vm14, %v240_v12, %v284_v44 }
 0x53a   :  { %vm712_vm1 = vmor %vm256_vm8, %vm300_vm0  ;;  %336 = vst.msk [vmem:[#allocation11] sm:$0xff] %vm335_vm15, %v333_v50 }
 0x53b   :  { %v299_v53 = vadd.s32 %v298_v47, %v296_v48  ;;  %v304_v54 = vsel %vm712_vm1, %v678_v45, -inf }
 0x53c   :  { %v306_v55 = vsel %vm215_vm3, %v304_v54, -inf }
 0x53d   :  { %307 = vmax.xlane.f32.xlu1 %v306_v55  ;;  %vm301_vm2 = vcmp.eq.s32.totalorder %v686_v52, %v299_v53  ;;  %v334_v56 = vsel %vm332_vm14, %v255_v17, %v299_v53 }
 0x53e   :  { %vm724_vm4 = vmor %vm257_vm9, %vm301_vm2  ;;  %337 = vst.msk [vmem:[#allocation11 + $0x8] sm:$0xff] %vm335_vm15, %v334_v56 }
 0x53f   :  { %v305_v58 = vsel %vm724_vm4, %v682_v49, -inf }
 0x540   :  { %v309_v45 = vsel %vm215_vm3, %v305_v58, -inf }
 0x541   :  { %310 = vmax.xlane.f32.xlu0 %v309_v45 }
 0x5ca   :  { %v308_v59 = vpop.xlane.xlu1 %307 }
 0x5cb   :  { %v312_v60 = vsub.f32 %v304_v54, %v308_v59 }
 0x5cd   :  { %v314_v61 = vmul.f32 1.442695, %v312_v60 }
 0x5ce   :  { %v311_v62 = vpop.xlane.xlu0 %310 }
 0x5cf   :  { %418 = vpow2.f32 %v314_v61  ;;  %v313_v63 = vsub.f32 %v305_v58, %v311_v62 }
 0x5d1   :  { %v316_v52 = vmul.f32 1.442695, %v313_v63 }
 0x5d3   :  { %420 = vpow2.f32 %v316_v52 }
 0x5d9   :  { %v419_v0 = vpop.eup %418 }
 0x5da   :  { %v318_v1 = vsel %vm712_vm1, %v419_v0, 0.0 }
 0x5db   :  { %v320_v2 = vsel %vm215_vm3, %v318_v1, 0.0 }
 0x5dc   :  { %321 = vadd.xlane.f32.xlu1 %v320_v2 }
 0x5dd   :  { %v421_v3 = vpop.eup %420 }
 0x5de   :  { %v319_v49 = vsel %vm724_vm4, %v421_v3, 0.0 }
 0x5df   :  { %v323_v4 = vsel %vm215_vm3, %v319_v49, 0.0 }
 0x5e0   :  { %324 = vadd.xlane.f32.xlu0 %v323_v4 }
 0x5e1   :  { %525 = shalt.err (!%p522_p8)
}
 0x5e2   :  { %s526_s23 = scalar_lea.hbm %s776_s5, 256 }
 0x5e3   :  { %p527_p9 = scmp.ne.s32.totalorder %s776_s5, %s526_s23  ;;  %p530_p10 = scmp.lt.u32.totalorder %s526_s23, %s776_s5 }
 0x5e5   :  { %p532_p11 = pnand %p530_p10, %p527_p9 }
 0x5e7   :  { %535 = shalt.err (!%p532_p11)
}
 0x5e8   :  { %361 = dma.vmem_to_hbm [thread:$0]  %s356_s18, 256, %s776_s5, [#allocation12], %s570_s30, %s570_s30, %s571_s6  }
 0x5e9   :  { %s576_s0 = smov [#allocation10]  }
 0x5ea   :  { %s343_s21 = sshll.u32 %s576_s0, 4  ;;  %s344_s21 = int_to_ptr.vmem [resolvable:$true] %s343_s21 }
 0x5eb   :  { %s536_s7 = scalar_lea.vmem %s344_s21, 256  ;;  %p541_p13 = scmp.lt.s32.totalorder %s344_s21, %s344_s21 }
 0x5ec   :  { %p537_p12 = scmp.ne.s32.totalorder %s344_s21, %s536_s7  ;;  %p542_p0 = scmp.lt.s32.totalorder %s536_s7, %s536_s7 }
 0x5ee   :  { %p543_p1 = por %p542_p0, %p541_p13 }
 0x5f0   :  { %p544_p2 = pnand %p543_p1, %p537_p12 }
 0x669   :  { %v322_v5 = vpop.xlane.xlu1 %321 }
 0x66a   :  { %422 = vrcp.f32 %v322_v5 }
 0x66d   :  { %v325_v6 = vpop.xlane.xlu0 %324 }
 0x66e   :  { %424 = vrcp.f32 %v325_v6 }
 0x674   :  { %v423_v7 = vpop.eup %422 }
 0x675   :  { %v328_v8 = vmul.f32 %v423_v7, %v318_v1 }
 0x677   :  { %330 = vst.msk [vmem:[#allocation10] sm:$0xff] %vm215_vm3, %v328_v8 }
 0x678   :  { %v425_v9 = vpop.eup %424 }
 0x679   :  { %v329_v10 = vmul.f32 %v425_v9, %v319_v49 }
 0x67b   :  { %331 = vst.msk [vmem:[#allocation10 + $0x8] sm:$0xff] %vm215_vm3, %v329_v10 }
 0x67c   :  { %547 = shalt.err (!%p544_p2)
}
 0x67d   :  { %s548_s9 = scalar_lea.hbm %s775_s4, 256 }
 0x67e   :  { %p549_p3 = scmp.ne.s32.totalorder %s775_s4, %s548_s9  ;;  %p552_p4 = scmp.lt.u32.totalorder %s548_s9, %s775_s4 }
 0x680   :  { %p554_p5 = pnand %p552_p4, %p549_p3 }
 0x682   :  { %557 = shalt.err (!%p554_p5)
}
 0x683   :  { %349 = dma.vmem_to_hbm [thread:$0]  %s344_s21, 256, %s775_s4, [#allocation4], %s570_s30, %s570_s30, %s571_s6  }
 0x684   :  { %564 = dma.done.wait [#allocation4], 256  }
 0x685   :  { %565 = vsyncadd [#allocation4], 4294967040 }
 0x686   :  { %566 = dma.done.wait [#allocation12], 256  }
 0x687   :  { %567 = vsyncadd [#allocation12], 4294967040 }
 0x688   :  { %368 = vsyncpa [#allocation3], 1 }
 0x689   :  { %369 = vsyncpa [#allocation6], 1 }
 0x68a   :  { %370 = vsyncpa [#allocation9], 1 }
 0x68b   :  { %371 = vsyncpa [#allocation4], 1 }
 0x68c   :  { %372 = vsyncpa [#allocation12], 1 }

</bundles_post_ra>
